<compile_context>
chip_gen: v7x
topology: tpu7x:2x2x1
jax: 0.10.0
libtpu: 0.0.40
codegen_flags: <defaults>
</compile_context>

<pallas_src>
import jax
import jax.numpy as jnp
from jax import lax
from jax.experimental import pallas as pl
from jax.experimental.pallas import tpu as pltpu

_ROW = 128                        # batch elements per row (lane width)
_OUT_F = 2                        # out_features of nn.Linear(1, 2)
_TR = 512                         # rows per grid step -> 64K batch elems/step
_GRIDLESS_MAX_BATCH = 128 * 1024  # single-shot VMEM path at or below this


def _linear_kernel(x_ref, w_ref, o_ref):
    """x_ref: (R, 128) f32 VMEM -- 128 batch elements per row.
    w_ref: (2,)     f32 SMEM -- the two nn.Linear weights.
    o_ref: (R, 256) f32 VMEM -- row-major identical to the (128*R, 2) output.
    Computes o[r, 2k + f] = x[r, k] * w[f].
    """
    f32 = jnp.float32
    x = x_ref[...]                                      # (R, 128) f32

    # Exact 3-way bf16 split: x == hi + mid + lo, each term bf16-representable,
    # so pushing each through a bf16 MXU pass (f32 accumulation) loses nothing
    # relative to a full-precision f32 multiply.
    hi = x.astype(jnp.bfloat16)
    r1 = x - hi.astype(f32)
    mid = r1.astype(jnp.bfloat16)
    lo = (r1 - mid.astype(f32)).astype(jnp.bfloat16)

    # One-hot dilation matrix: S01[k, c] = 1 iff c in {2k, 2k+1}.
    # (x @ S01)[r, 2k + f] = x[r, k]  -- the MXU performs the lane interleave.
    kk = lax.broadcasted_iota(jnp.int32, (_ROW, _ROW * _OUT_F), 0)
    cc = lax.broadcasted_iota(jnp.int32, (_ROW, _ROW * _OUT_F), 1)
    sel = jnp.logical_or(cc == 2 * kk, cc == 2 * kk + 1)
    s01 = jnp.where(sel, 1.0, 0.0).astype(jnp.bfloat16)  # (128, 256)

    dil = (jnp.dot(hi, s01, preferred_element_type=f32)
           + jnp.dot(mid, s01, preferred_element_type=f32)
           + jnp.dot(lo, s01, preferred_element_type=f32))  # (R, 256) dilated x

    # Per-lane weight pattern [w0, w1, w0, w1, ...] from the two SMEM scalars.
    lane = lax.broadcasted_iota(jnp.int32, (1, _ROW * _OUT_F), 1)
    wpat = jnp.where((lane & 1) == 0, w_ref[0], w_ref[1])   # (1, 256) f32

    o_ref[...] = (dil * wpat).astype(o_ref.dtype)


@jax.jit
def linear_net(x, w):
    """LinearNet forward: x (B, 1) f32, w (2, 1) f32 -> (B, 2) f32 == x @ w.T."""
    batch, in_f = x.shape
    assert in_f == 1, "kernel is specialised to in_features == 1"
    assert w.shape == (_OUT_F, 1), "kernel is specialised to out_features == 2"
    w_flat = w.reshape(_OUT_F).astype(jnp.float32)

    use_grid = batch > _GRIDLESS_MAX_BATCH
    chunk = (_TR if use_grid else 8) * _ROW          # pad granularity
    padded = ((batch + chunk - 1) // chunk) * chunk
    if padded != batch:                              # only unaligned sizes pay this
        x = jnp.pad(x, ((0, padded - batch), (0, 0)))
    rows = padded // _ROW
    x2 = x.reshape(rows, _ROW)                       # free row-major view

    out_shape = jax.ShapeDtypeStruct((rows, _ROW * _OUT_F), jnp.float32)
    if use_grid:
        out2 = pl.pallas_call(
            _linear_kernel,
            out_shape=out_shape,
            grid=(rows // _TR,),
            in_specs=[
                pl.BlockSpec((_TR, _ROW), lambda i: (i, 0)),
                pl.BlockSpec(memory_space=pltpu.MemorySpace.SMEM),
            ],
            out_specs=pl.BlockSpec((_TR, _ROW * _OUT_F), lambda i: (i, 0)),
            compiler_params=pltpu.CompilerParams(
                dimension_semantics=("parallel",)),
        )(x2, w_flat)
    else:
        # Gridless: whole arrays resident in VMEM, zero per-step pipeline
        # overhead.  Footprint stays well under v5e's 16 MiB default scoped
        # VMEM because of the _GRIDLESS_MAX_BATCH cutoff.
        out2 = pl.pallas_call(
            _linear_kernel,
            out_shape=out_shape,
            in_specs=[
                pl.BlockSpec(memory_space=pltpu.MemorySpace.VMEM),
                pl.BlockSpec(memory_space=pltpu.MemorySpace.SMEM),
            ],
            out_specs=pl.BlockSpec(memory_space=pltpu.MemorySpace.VMEM),
        )(x2, w_flat)

    out = out2.reshape(padded, _OUT_F)               # zero-copy: same byte order
    if padded != batch:
        out = out[:batch]
    return out


if __name__ == "__main__":
    key = jax.random.PRNGKey(0)
    kx, kw = jax.random.split(key)

    # nn.Linear(1, 2, bias=False) init range: U(-1/sqrt(fan_in), 1/sqrt(fan_in))
    # with fan_in = 1 -> U(-1, 1).
    w = jax.random.uniform(kw, (2, 1), jnp.float32, -1.0, 1.0)

    # Small batch: exercises the gridless whole-array VMEM path.
    B = 8
    x = jax.random.normal(kx, (B, 1), jnp.float32)
    out = jax.block_until_ready(linear_net(x, w))
    ref = x * w.T                       # exact f32 reference for x @ w.T
    assert out.shape == (B, 2)
    assert jnp.allclose(out, ref, atol=1e-6, rtol=1e-6), "small-batch mismatch"

    # Large batch: exercises the 64K-element/step 'parallel' tiled path.
    B2 = 1 << 20
    x2 = jax.random.normal(kx, (B2, 1), jnp.float32)
    out2 = jax.block_until_ready(linear_net(x2, w))
    ref2 = x2 * w.T
    assert out2.shape == (B2, 2)
    assert jnp.allclose(out2, ref2, atol=1e-6, rtol=1e-6), "tiled-batch mismatch"

    print("KERNEL_OK")
</pallas_src>

<mosaic_0001>
module attributes {stable_mosaic.version = 11 : i64} {
  func.func @_linear_kernel(%arg0: memref<8x128xf32, #tpu.memory_space<vmem>>, %arg1: memref<2xf32, #tpu.memory_space<smem>>, %arg2: memref<8x256xf32, #tpu.memory_space<vmem>>) attributes {dimension_semantics = [], scalar_prefetch = 0 : i64, scratch_operands = 0 : i64, tpu.core_type = #tpu.core_type<tc>} {
    %c0 = arith.constant 0 : index
    %c0_0 = arith.constant 0 : index
    %0 = vector.load %arg0[%c0, %c0_0] : memref<8x128xf32, #tpu.memory_space<vmem>>, vector<8x128xf32>
    %1 = arith.truncf %0 : vector<8x128xf32> to vector<8x128xbf16>
    %2 = arith.extf %1 : vector<8x128xbf16> to vector<8x128xf32>
    %3 = arith.subf %0, %2 : vector<8x128xf32>
    %4 = arith.truncf %3 : vector<8x128xf32> to vector<8x128xbf16>
    %5 = arith.extf %4 : vector<8x128xbf16> to vector<8x128xf32>
    %6 = arith.subf %3, %5 : vector<8x128xf32>
    %7 = arith.truncf %6 : vector<8x128xf32> to vector<8x128xbf16>
    %8 = tpu.iota {dimensions = array<i32: 0>} : vector<128x256xi32>
    %9 = tpu.iota {dimensions = array<i32: 1>} : vector<128x256xi32>
    %c2_i32 = arith.constant 2 : i32
    %10 = vector.broadcast %c2_i32 : i32 to vector<128x256xi32>
    %11 = arith.muli %10, %8 : vector<128x256xi32>
    %12 = arith.cmpi eq, %9, %11 : vector<128x256xi32>
    %c2_i32_1 = arith.constant 2 : i32
    %13 = vector.broadcast %c2_i32_1 : i32 to vector<128x256xi32>
    %14 = arith.muli %13, %8 : vector<128x256xi32>
    %c1_i32 = arith.constant 1 : i32
    %15 = vector.broadcast %c1_i32 : i32 to vector<128x256xi32>
    %16 = arith.addi %14, %15 : vector<128x256xi32>
    %17 = arith.cmpi eq, %9, %16 : vector<128x256xi32>
    %18 = arith.ori %12, %17 : vector<128x256xi1>
    %cst = arith.constant 1.000000e+00 : f32
    %cst_2 = arith.constant 0.000000e+00 : f32
    %19 = vector.broadcast %cst : f32 to vector<128x256xf32>
    %20 = vector.broadcast %cst_2 : f32 to vector<128x256xf32>
    %21 = arith.select %18, %19, %20 : vector<128x256xi1>, vector<128x256xf32>
    %22 = arith.truncf %21 : vector<128x256xf32> to vector<128x256xbf16>
    %cst_3 = arith.constant dense<0.000000e+00> : vector<8x256xf32>
    %23 = tpu.matmul %1, %22, %cst_3 {dimension_numbers = #tpu.dot_dimension_numbers<[1], [0], [0], [1], [0, 0, 1, 1], [], []>} : vector<8x128xbf16>, vector<128x256xbf16>, vector<8x256xf32> -> vector<8x256xf32>
    %cst_4 = arith.constant dense<0.000000e+00> : vector<8x256xf32>
    %24 = tpu.matmul %4, %22, %cst_4 {dimension_numbers = #tpu.dot_dimension_numbers<[1], [0], [0], [1], [0, 0, 1, 1], [], []>} : vector<8x128xbf16>, vector<128x256xbf16>, vector<8x256xf32> -> vector<8x256xf32>
    %25 = arith.addf %23, %24 : vector<8x256xf32>
    %cst_5 = arith.constant dense<0.000000e+00> : vector<8x256xf32>
    %26 = tpu.matmul %7, %22, %cst_5 {dimension_numbers = #tpu.dot_dimension_numbers<[1], [0], [0], [1], [0, 0, 1, 1], [], []>} : vector<8x128xbf16>, vector<128x256xbf16>, vector<8x256xf32> -> vector<8x256xf32>
    %27 = arith.addf %25, %26 : vector<8x256xf32>
    %28 = tpu.iota {dimensions = array<i32: 1>} : vector<1x256xi32>
    %c1_i32_6 = arith.constant 1 : i32
    %29 = vector.broadcast %c1_i32_6 : i32 to vector<1x256xi32>
    %30 = arith.andi %28, %29 : vector<1x256xi32>
    %c0_i32 = arith.constant 0 : i32
    %31 = vector.broadcast %c0_i32 : i32 to vector<1x256xi32>
    %32 = arith.cmpi eq, %30, %31 : vector<1x256xi32>
    %c0_7 = arith.constant 0 : index
    %33 = memref.load %arg1[%c0_7] : memref<2xf32, #tpu.memory_space<smem>>
    %c1 = arith.constant 1 : index
    %34 = memref.load %arg1[%c1] : memref<2xf32, #tpu.memory_space<smem>>
    %35 = vector.broadcast %33 : f32 to vector<1x256xf32>
    %36 = vector.broadcast %34 : f32 to vector<1x256xf32>
    %37 = arith.select %32, %35, %36 : vector<1x256xi1>, vector<1x256xf32>
    %38 = vector.broadcast %37 : vector<1x256xf32> to vector<8x256xf32>
    %39 = arith.mulf %27, %38 : vector<8x256xf32>
    %c0_8 = arith.constant 0 : index
    %c0_9 = arith.constant 0 : index
    %40 = vector.load %arg2[%c0_8, %c0_9] : memref<8x256xf32, #tpu.memory_space<vmem>>, vector<8x256xf32>
    tpu.vector_store %arg2[%c0_8, %c0_9], %39 {strides = array<i32>} : memref<8x256xf32, #tpu.memory_space<vmem>>, vector<8x256xf32>,
    return
  }
}

</mosaic_0001>

<bundles_post_ra>
// kernel: linear_net.1
= control target key start
LH: loop header
LB: loop body
LE: loop exit
PB: predicated region body
PF: predicated region fallthrough
CT: control target
= control target key end

     0   :  { %7 = vsyncpa [#allocation3], 0  ;;  %s829_s0 = inlined_call_operand.vmem [shape: f32[8,128], index: 0, kind: input, shape index: {}]   ;;  %s830_s1 = inlined_call_operand.vmem [shape: f32[2], index: 1, kind: input, shape index: {}]   ;;  %s831_s2 = inlined_call_operand.vmem [shape: f32[8,256], index: 2, kind: output, shape index: {}]  }
   0x1   :  { %s16_s11 = sshll.u32 %s830_s1, 4  ;;  %s17_s11 = int_to_ptr.vmem [resolvable:$true] %s16_s11 }
   0x2   :  { %s479_s12 = scalar_lea.vmem %s17_s11, 16  ;;  %p484_p1 = scmp.lt.s32.totalorder %s17_s11, %s17_s11 }
   0x3   :  { %p480_p0 = scmp.ne.s32.totalorder %s17_s11, %s479_s12  ;;  %p485_p2 = scmp.lt.s32.totalorder %s479_s12, %s479_s12 }
   0x5   :  { %p486_p3 = por %p485_p2, %p484_p1 }
   0x7   :  { %p487_p4 = pnand %p486_p3, %p480_p0 }
   0x9   :  { %490 = shalt.err (!%p487_p4)
}
   0xa   :  { %s493_s13 = smov [#allocation2]  }
   0xb   :  { %19 = dma.vmem_to_smem %s17_s11, 16, %s493_s13, [#allocation3]  }
   0xc   :  { %491 = dma.done.wait [#allocation3], 16  }
   0xd   :  { %492 = vsyncadd [#allocation3], 4294967280 }
   0xe   :  { %23 = sfence }
   0xf   :  { %v33_v0 = vlaneseq  ;;  %v494_v1 = vmov 0   ;;  %v495_v23 = vmov 1.0|1.0   ;;  %v849_v33 = vmov 0  ;;  %s469_s15 = sld [smem:[#allocation2 + $0x1]] }
  0x10   :  { %302 = vmatprep.mubr.bf16.mxu0 %v494_v1  ;;  %261 = vmatprep.mubr.bf16.mxu1 %v494_v1  ;;  %v851_v37 = vmov 0  ;;  %v853_v41 = vmov 0  ;;  %v855_v45 = vmov 0  ;;  %v857_v49 = vmov 0 }
  0x11   :  { %v516_v2 = vshrl.u32 %v33_v0, 7  ;;  %v518_v3 = vand.u32 127, %v33_v0  ;;  %v859_v53 = vmov 0  ;;  %v861_v57 = vmov 0 }
  0x12   :  { %v863_v61 = vmov 0  ;;  %v865_v63 = vmov 0 }
  0x13   :  { %v35_v4 = vadd.s32 8, %v516_v2  ;;  %v522_v5 = vadd.s32 128, %v518_v3  ;;  %v53_v6 = vmul.u32 2, %v516_v2  ;;  %v36_v7 = vadd.s32 16, %v516_v2 }
  0x14   :  { %v37_v8 = vadd.s32 24, %v516_v2  ;;  %v38_v13 = vadd.s32 32, %v516_v2  ;;  %v39_v15 = vadd.s32 40, %v516_v2  ;;  %v40_v22 = vadd.s32 48, %v516_v2 }
  0x15   :  { %v54_v9 = vmul.u32 2, %v35_v4  ;;  %vm70_vm0 = vcmp.eq.s32.totalorder %v522_v5, %v53_v6  ;;  %v101_v10 = vadd.s32 1, %v53_v6  ;;  %vm69_vm1 = vcmp.eq.s32.totalorder %v518_v3, %v53_v6  ;;  %v25_v4 = vld [vmem:[%s829_s0] sm:$0xff]  ;;  %s358_s0 = sld [smem:[#allocation2]] }
  0x16   :  { %v55_v11 = vmul.u32 2, %v36_v7  ;;  %v56_v12 = vmul.u32 2, %v37_v8  ;;  %v41_v24 = vadd.s32 56, %v516_v2  ;;  %v42_v31 = vadd.s32 64, %v516_v2 }
  0x17   :  { %vm72_vm2 = vcmp.eq.s32.totalorder %v522_v5, %v54_v9  ;;  %v102_v14 = vadd.s32 1, %v54_v9  ;;  %vm118_vm3 = vcmp.eq.s32.totalorder %v522_v5, %v101_v10  ;;  %vm117_vm5 = vcmp.eq.s32.totalorder %v518_v3, %v101_v10 }
  0x18   :  { %vm150_vm4 = vmor %vm70_vm0, %vm118_vm3  ;;  %v103_v16 = vadd.s32 1, %v55_v11  ;;  %vm71_vm7 = vcmp.eq.s32.totalorder %v518_v3, %v54_v9  ;;  %v104_v18 = vadd.s32 1, %v56_v12  ;;  %v57_v19 = vmul.u32 2, %v38_v13 }
  0x19   :  { %vm120_vm6 = vcmp.eq.s32.totalorder %v522_v5, %v102_v14  ;;  %vm119_vm8 = vcmp.eq.s32.totalorder %v518_v3, %v102_v14  ;;  %vm537_vm9 = vmor %vm69_vm1, %vm117_vm5  ;;  %vm74_vm12 = vcmp.eq.s32.totalorder %v522_v5, %v55_v11  ;;  %v58_v21 = vmul.u32 2, %v39_v15 }
  0x1a   :  { %vm152_vm10 = vmor %vm72_vm2, %vm120_vm6  ;;  %vm122_vm13 = vcmp.eq.s32.totalorder %v522_v5, %v103_v16  ;;  %vm76_vm15 = vcmp.eq.s32.totalorder %v522_v5, %v56_v12  ;;  %vm124_vm0 = vcmp.eq.s32.totalorder %v522_v5, %v104_v18  ;;  %v105_v26 = vadd.s32 1, %v57_v19 }
  0x1b   :  { %vm541_vm11 = vmpackc.low %vm152_vm10, %vm150_vm4  ;;  %vm73_vm3 = vcmp.eq.s32.totalorder %v518_v3, %v55_v11  ;;  %vm121_vm4 = vcmp.eq.s32.totalorder %v518_v3, %v103_v16  ;;  %v106_v27 = vadd.s32 1, %v58_v21  ;;  %vm75_vm6 = vcmp.eq.s32.totalorder %v518_v3, %v56_v12 }
  0x1c   :  { %406 = vmatprep.subr.msk.bf16.mxu0 %vm541_vm11, %v495_v23  ;;  %vm151_vm14 = vmor %vm71_vm7, %vm119_vm8  ;;  %374 = vmatprep.subr.msk.bf16.mxu1 %vm541_vm11, %v495_v23  ;;  %vm123_vm7 = vcmp.eq.s32.totalorder %v518_v3, %v104_v18  ;;  %v59_v28 = vmul.u32 2, %v40_v22  ;;  %v60_v30 = vmul.u32 2, %v41_v24  ;;  %vm78_vm10 = vcmp.eq.s32.totalorder %v522_v5, %v57_v19 }
  0x1d   :  { %vm559_vm1 = vmpackc.low %vm151_vm14, %vm537_vm9  ;;  %vm80_vm14 = vcmp.eq.s32.totalorder %v522_v5, %v58_v21  ;;  %v43_v32 = vadd.s32 72, %v516_v2  ;;  %v61_v36 = vmul.u32 2, %v42_v31  ;;  %v44_v39 = vadd.s32 80, %v516_v2 }
  0x1e   :  { %408 = vmatpush1.bf16.msk.msra.mxu0 %vm559_vm1, %v495_v23  ;;  %vm154_vm2 = vmor %vm74_vm12, %vm122_vm13  ;;  %376 = vmatpush1.bf16.msk.msra.mxu1 %vm559_vm1, %v495_v23  ;;  %vm126_vm12 = vcmp.eq.s32.totalorder %v522_v5, %v105_v26  ;;  %v107_v34 = vadd.s32 1, %v59_v28  ;;  %v108_v35 = vadd.s32 1, %v60_v30  ;;  %v45_v40 = vadd.s32 88, %v516_v2 }
  0x1f   :  { %vm156_vm5 = vmor %vm76_vm15, %vm124_vm0  ;;  %vm128_vm15 = vcmp.eq.s32.totalorder %v522_v5, %v106_v27  ;;  %v62_v38 = vmul.u32 2, %v43_v32  ;;  %v109_v42 = vadd.s32 1, %v61_v36  ;;  %v63_v44 = vmul.u32 2, %v44_v39 }
  0x20   :  { %vm573_vm8 = vmpackc.low %vm156_vm5, %vm154_vm2  ;;  %v64_v46 = vmul.u32 2, %v45_v40  ;;  %v46_v47 = vadd.s32 96, %v516_v2  ;;  %v47_v48 = vadd.s32 104, %v516_v2  ;;  %v48_v55 = vadd.s32 112, %v516_v2 }
  0x21   :  { %410 = vmatprep.subr.msk.bf16.mxu0 %vm573_vm8, %v495_v23  ;;  %vm153_vm9 = vmor %vm73_vm3, %vm121_vm4  ;;  %378 = vmatprep.subr.msk.bf16.mxu1 %vm573_vm8, %v495_v23  ;;  %vm77_vm3 = vcmp.eq.s32.totalorder %v518_v3, %v57_v19  ;;  %vm125_vm4 = vcmp.eq.s32.totalorder %v518_v3, %v105_v26  ;;  %v110_v43 = vadd.s32 1, %v62_v38  ;;  %v111_v50 = vadd.s32 1, %v63_v44 }
  0x22   :  { %vm155_vm13 = vmor %vm75_vm6, %vm123_vm7  ;;  %vm79_vm6 = vcmp.eq.s32.totalorder %v518_v3, %v58_v21  ;;  %vm127_vm7 = vcmp.eq.s32.totalorder %v518_v3, %v106_v27  ;;  %v112_v51 = vadd.s32 1, %v64_v46  ;;  %v65_v52 = vmul.u32 2, %v46_v47 }
  0x23   :  { %vm589_vm0 = vmpackc.low %vm155_vm13, %vm153_vm9  ;;  %vm130_vm13 = vcmp.eq.s32.totalorder %v522_v5, %v107_v34  ;;  %v66_v54 = vmul.u32 2, %v47_v48  ;;  %v49_v56 = vadd.s32 120, %v516_v2  ;;  %v67_v60 = vmul.u32 2, %v48_v55 }
  0x24   :  { %v850_v33 = vsel %vm589_vm0, 4294967295, %v849_v33  ;;  %412 = vmatpush1.bf16.msk.msra.mxu0 %vm589_vm0, %v495_v23  ;;  %vm158_vm2 = vmor %vm78_vm10, %vm126_vm12  ;;  %380 = vmatpush1.bf16.msk.msra.mxu1 %vm589_vm0, %v495_v23  ;;  %vm82_vm12 = vcmp.eq.s32.totalorder %v522_v5, %v59_v28  ;;  %v113_v58 = vadd.s32 1, %v65_v52  ;;  %v26_v7 = vpack.c.bf16 %v25_v4, %v25_v4 }
  0x25   :  { %vm160_vm5 = vmor %vm80_vm14, %vm128_vm15  ;;  %vm84_vm15 = vcmp.eq.s32.totalorder %v522_v5, %v60_v30  ;;  %v114_v59 = vadd.s32 1, %v66_v54  ;;  %v68_v62 = vmul.u32 2, %v49_v56  ;;  %v115_v0 = vadd.s32 1, %v67_v60 }
  0x26   :  { %vm603_vm9 = vmpackc.low %vm160_vm5, %vm158_vm2  ;;  %vm132_vm2 = vcmp.eq.s32.totalorder %v522_v5, %v108_v35  ;;  %vm141_vm0 = vcmp.eq.s32.totalorder %v518_v3, %v113_v58  ;;  %v27_v9 = vunpack.c.l.bf16 %v26_v7  ;;  %v354_v20 = vand.u32 1, %v518_v3 }
  0x27   :  { %v852_v37 = vsel %vm603_vm9, 4294967295, %v851_v37  ;;  %414 = vmatprep.subr.msk.bf16.mxu0 %vm603_vm9, %v495_v23  ;;  %vm157_vm10 = vmor %vm77_vm3, %vm125_vm4  ;;  %382 = vmatprep.subr.msk.bf16.mxu1 %vm603_vm9, %v495_v23  ;;  %vm81_vm4 = vcmp.eq.s32.totalorder %v518_v3, %v59_v28  ;;  %v116_v2 = vadd.s32 1, %v68_v62  ;;  %v355_v21 = vand.u32 1, %v522_v5 }
  0x28   :  { %vm159_vm14 = vmor %vm79_vm6, %vm127_vm7  ;;  %vm129_vm6 = vcmp.eq.s32.totalorder %v518_v3, %v107_v34  ;;  %v28_v11 = vsub.f32 %v25_v4, %v27_v9  ;;  %v360_v22 = vstv %s358_s0  ;;  %v361_v24 = vstv %s469_s15 }
  0x29   :  { %vm619_vm5 = vmpackc.low %vm159_vm14, %vm157_vm10  ;;  %vm83_vm10 = vcmp.eq.s32.totalorder %v518_v3, %v60_v30  ;;  %vm131_vm14 = vcmp.eq.s32.totalorder %v518_v3, %v108_v35 }
  0x2a   :  { %v854_v41 = vsel %vm619_vm5, 4294967295, %v853_v41  ;;  %416 = vmatpush1.bf16.msk.msra.mxu0 %vm619_vm5, %v495_v23  ;;  %vm162_vm3 = vmor %vm82_vm12, %vm130_vm13  ;;  %384 = vmatpush1.bf16.msk.msra.mxu1 %vm619_vm5, %v495_v23  ;;  %vm86_vm13 = vcmp.eq.s32.totalorder %v522_v5, %v61_v36  ;;  %vm134_vm5 = vcmp.eq.s32.totalorder %v522_v5, %v109_v42  ;;  %v29_v13 = vpack.c.bf16 %v28_v11, %v28_v11 }
  0x2b   :  { %vm164_vm7 = vmor %vm84_vm15, %vm132_vm2  ;;  %vm88_vm2 = vcmp.eq.s32.totalorder %v522_v5, %v62_v38 }
  0x2c   :  { %vm633_vm9 = vmpackc.low %vm164_vm7, %vm162_vm3  ;;  %vm136_vm3 = vcmp.eq.s32.totalorder %v522_v5, %v110_v43 }
  0x2d   :  { %v856_v45 = vsel %vm633_vm9, 4294967295, %v855_v45  ;;  %418 = vmatprep.subr.msk.bf16.mxu0 %vm633_vm9, %v495_v23  ;;  %vm161_vm12 = vmor %vm81_vm4, %vm129_vm6  ;;  %386 = vmatprep.subr.msk.bf16.mxu1 %vm633_vm9, %v495_v23  ;;  %vm85_vm6 = vcmp.eq.s32.totalorder %v518_v3, %v61_v36 }
  0x2e   :  { %vm163_vm15 = vmor %vm83_vm10, %vm131_vm14  ;;  %vm133_vm10 = vcmp.eq.s32.totalorder %v518_v3, %v109_v42 }
  0x2f   :  { %vm649_vm7 = vmpackc.low %vm163_vm15, %vm161_vm12  ;;  %vm87_vm12 = vcmp.eq.s32.totalorder %v518_v3, %v62_v38  ;;  %vm135_vm15 = vcmp.eq.s32.totalorder %v518_v3, %v110_v43 }
  0x30   :  { %v858_v49 = vsel %vm649_vm7, 4294967295, %v857_v49  ;;  %420 = vmatpush1.bf16.msk.msra.mxu0 %vm649_vm7, %v495_v23  ;;  %vm166_vm4 = vmor %vm86_vm13, %vm134_vm5  ;;  %388 = vmatpush1.bf16.msk.msra.mxu1 %vm649_vm7, %v495_v23  ;;  %vm90_vm13 = vcmp.eq.s32.totalorder %v522_v5, %v63_v44  ;;  %vm138_vm7 = vcmp.eq.s32.totalorder %v522_v5, %v111_v50 }
  0x31   :  { %vm168_vm14 = vmor %vm88_vm2, %vm136_vm3  ;;  %vm92_vm3 = vcmp.eq.s32.totalorder %v522_v5, %v64_v46 }
  0x32   :  { %vm663_vm9 = vmpackc.low %vm168_vm14, %vm166_vm4  ;;  %vm140_vm4 = vcmp.eq.s32.totalorder %v522_v5, %v112_v51 }
  0x33   :  { %v860_v53 = vsel %vm663_vm9, 4294967295, %v859_v53  ;;  %422 = vmatprep.subr.msk.bf16.mxu0 %vm663_vm9, %v495_v23  ;;  %vm165_vm5 = vmor %vm85_vm6, %vm133_vm10  ;;  %390 = vmatprep.subr.msk.bf16.mxu1 %vm663_vm9, %v495_v23  ;;  %vm89_vm10 = vcmp.eq.s32.totalorder %v518_v3, %v63_v44 }
  0x34   :  { %vm167_vm2 = vmor %vm87_vm12, %vm135_vm15  ;;  %vm137_vm12 = vcmp.eq.s32.totalorder %v518_v3, %v111_v50 }
  0x35   :  { %vm679_vm14 = vmpackc.low %vm167_vm2, %vm165_vm5  ;;  %vm91_vm5 = vcmp.eq.s32.totalorder %v518_v3, %v64_v46  ;;  %vm139_vm2 = vcmp.eq.s32.totalorder %v518_v3, %v112_v51 }
  0x36   :  { %v862_v57 = vsel %vm679_vm14, 4294967295, %v861_v57  ;;  %424 = vmatpush1.bf16.msk.msra.mxu0 %vm679_vm14, %v495_v23  ;;  %vm170_vm6 = vmor %vm90_vm13, %vm138_vm7  ;;  %392 = vmatpush1.bf16.msk.msra.mxu1 %vm679_vm14, %v495_v23  ;;  %vm94_vm13 = vcmp.eq.s32.totalorder %v522_v5, %v65_v52  ;;  %vm142_vm14 = vcmp.eq.s32.totalorder %v522_v5, %v113_v58 }
  0x37   :  { %vm172_vm15 = vmor %vm92_vm3, %vm140_vm4  ;;  %vm96_vm4 = vcmp.eq.s32.totalorder %v522_v5, %v66_v54 }
  0x38   :  { %vm693_vm9 = vmpackc.low %vm172_vm15, %vm170_vm6  ;;  %vm144_vm6 = vcmp.eq.s32.totalorder %v522_v5, %v114_v59 }
  0x39   :  { %v864_v61 = vsel %vm693_vm9, 4294967295, %v863_v61  ;;  %426 = vmatprep.subr.msk.bf16.mxu0 %vm693_vm9, %v495_v23  ;;  %vm169_vm7 = vmor %vm89_vm10, %vm137_vm12  ;;  %394 = vmatprep.subr.msk.bf16.mxu1 %vm693_vm9, %v495_v23  ;;  %vm93_vm12 = vcmp.eq.s32.totalorder %v518_v3, %v65_v52  ;;  %vm146_vm9 = vcmp.eq.s32.totalorder %v522_v5, %v115_v0 }
  0x3a   :  { %vm171_vm3 = vmor %vm91_vm5, %vm139_vm2  ;;  %vm95_vm2 = vcmp.eq.s32.totalorder %v518_v3, %v66_v54 }
  0x3b   :  { %vm707_vm15 = vmpackc.low %vm171_vm3, %vm169_vm7  ;;  %vm143_vm7 = vcmp.eq.s32.totalorder %v518_v3, %v114_v59 }
  0x3c   :  { %v866_v63 = vsel %vm707_vm15, 4294967295, %v865_v63  ;;  %428 = vmatpush1.bf16.msk.msra.mxu0 %vm707_vm15, %v495_v23  ;;  %vm174_vm10 = vmor %vm94_vm13, %vm142_vm14  ;;  %396 = vmatpush1.bf16.msk.msra.mxu1 %vm707_vm15, %v495_v23  ;;  %vm98_vm13 = vcmp.eq.s32.totalorder %v522_v5, %v67_v60  ;;  %vm145_vm15 = vcmp.eq.s32.totalorder %v518_v3, %v115_v0 }
  0x3d   :  { %vm176_vm5 = vmor %vm96_vm4, %vm144_vm6  ;;  %vm100_vm6 = vcmp.eq.s32.totalorder %v522_v5, %v68_v62 }
  0x3e   :  { %vm724_vm3 = vmpackc.low %vm176_vm5, %vm174_vm10  ;;  %vm148_vm10 = vcmp.eq.s32.totalorder %v522_v5, %v116_v2 }
  0x3f   :  { %430 = vmatprep.subr.msk.bf16.mxu0 %vm724_vm3, %v495_v23  ;;  %vm173_vm14 = vmor %vm93_vm12, %vm141_vm0  ;;  %398 = vmatprep.subr.msk.bf16.mxu1 %vm724_vm3, %v495_v23  ;;  %vm97_vm12 = vcmp.eq.s32.totalorder %v518_v3, %v67_v60 }
  0x40   :  { %vm175_vm4 = vmor %vm95_vm2, %vm143_vm7  ;;  %vm99_vm7 = vcmp.eq.s32.totalorder %v518_v3, %v68_v62 }
  0x41   :  { %vm738_vm5 = vmpackc.low %vm175_vm4, %vm173_vm14  ;;  %vm147_vm14 = vcmp.eq.s32.totalorder %v518_v3, %v116_v2 }
  0x42   :  { %432 = vmatpush1.bf16.msk.msra.mxu0 %vm738_vm5, %v495_v23  ;;  %vm178_vm0 = vmor %vm98_vm13, %vm146_vm9  ;;  %400 = vmatpush1.bf16.msk.msra.mxu1 %vm738_vm5, %v495_v23 }
  0x43   :  { %vm180_vm2 = vmor %vm100_vm6, %vm148_vm10  ;;  %vm877_vm10 = vnez %v854_v41 }
  0x44   :  { %vm752_vm4 = vmpackc.low %vm180_vm2, %vm178_vm0  ;;  %vm879_vm0 = vnez %v858_v49  ;;  %vm882_vm2 = vnez %v864_v61 }
  0x45   :  { %434 = vmatprep.subr.msk.bf16.mxu0 %vm752_vm4, %v495_v23  ;;  %vm177_vm9 = vmor %vm97_vm12, %vm145_vm15  ;;  %402 = vmatprep.subr.msk.bf16.mxu1 %vm752_vm4, %v495_v23  ;;  %vm875_vm15 = vnez %v850_v33  ;;  %vm881_vm12 = vnez %v862_v57 }
  0x46   :  { %vm179_vm13 = vmor %vm99_vm7, %vm147_vm14  ;;  %vm883_vm7 = vnez %v866_v63 }
  0x47   :  { %vm762_vm6 = vmpackc.low %vm179_vm13, %vm177_vm9 }
  0x48   :  { %436 = vmatpush1.bf16.msk.msra.mxu0 %vm762_vm6, %v495_v23  ;;  %404 = vmatpush1.bf16.msk.msra.mxu1 %vm762_vm6, %v495_v23 }
  0x49   :  { %438 = vmatprep.subr.msk.bf16.mxu0 %vm541_vm11, %v495_v23  ;;  %vm876_vm11 = vnez %v852_v37 }
  0x4b   :  { %303 = vmatmul.mubr.bf16.vlgmr.msra.gmra.mrb[0].mxu0 %v26_v7  ;;  %262 = vmatmul.mubr.bf16.vlgmr.msra.gmra.mrb[0].mxu1 %v29_v13 }
  0x4c   :  { %440 = vmatpush1.bf16.msk.msra.mxu0 %vm559_vm1, %v495_v23  ;;  %343 = vmatprep.mubr.bf16.mxu0 %v494_v1  ;;  %vm878_vm1 = vnez %v856_v45  ;;  %v30_v1 = vunpack.c.l.bf16 %v29_v13 }
  0x4d   :  { %442 = vmatprep.subr.msk.bf16.mxu0 %vm573_vm8, %v495_v23  ;;  %vm880_vm8 = vnez %v860_v53 }
  0x4e   :  { %v31_v14 = vsub.f32 %v28_v11, %v30_v1 }
  0x50   :  { %444 = vmatpush1.bf16.msk.msra.mxu0 %vm875_vm15, %v495_v23  ;;  %v32_v15 = vpack.c.bf16 %v31_v14, %v31_v14 }
  0x51   :  { %446 = vmatprep.subr.msk.bf16.mxu0 %vm876_vm11, %v495_v23 }
  0x54   :  { %448 = vmatpush1.bf16.msk.msra.mxu0 %vm877_vm10, %v495_v23 }
  0x55   :  { %450 = vmatprep.subr.msk.bf16.mxu0 %vm878_vm1, %v495_v23 }
  0x58   :  { %452 = vmatpush1.bf16.msk.msra.mxu0 %vm879_vm0, %v495_v23 }
  0x59   :  { %454 = vmatprep.subr.msk.bf16.mxu0 %vm880_vm8, %v495_v23 }
  0x5c   :  { %456 = vmatpush1.bf16.msk.msra.mxu0 %vm881_vm12, %v495_v23 }
  0x5d   :  { %458 = vmatprep.subr.msk.bf16.mxu0 %vm882_vm2, %v495_v23 }
  0x60   :  { %460 = vmatpush1.bf16.msk.msra.mxu0 %vm883_vm7, %v495_v23 }
  0x61   :  { %462 = vmatprep.subr.msk.bf16.mxu0 %vm724_vm3, %v495_v23  ;;  %vm356_vm3 = vcmp.eq.s32.totalorder %v354_v20, 0 }
  0x62   :  { %v362_v26 = vsel %vm356_vm3, %v360_v22, %v361_v24 }
  0x64   :  { %464 = vmatpush1.bf16.msk.msra.mxu0 %vm738_vm5, %v495_v23  ;;  %vm357_vm5 = vcmp.eq.s32.totalorder %v355_v21, 0 }
  0x65   :  { %466 = vmatprep.subr.msk.bf16.mxu0 %vm752_vm4, %v495_v23 }
  0x68   :  { %468 = vmatpush1.bf16.msk.msra.mxu0 %vm762_vm6, %v495_v23  ;;  %v363_v23 = vsel %vm357_vm5, %v360_v22, %v361_v24 }
  0x6b   :  { %344 = vmatmul.mubr.bf16.vlgmr.msra.gmra.mrb[0].mxu0 %v32_v15 }
 0x11e   :  { %v263_v16 = vpop.f32.mrb[0].mxu1 }
 0x11f   :  { %v265_v17 = vpop.f32.mrb[1].mxu1 }
 0x120   :  { %v267_v18 = vpop.f32.mrb[2].mxu1 }
 0x121   :  { %v268_v19 = vpop.f32.mrb[3].mxu1 }
 0x13e   :  { %v345_v25 = vpop.f32.mrb[0].mxu0 }
 0x13f   :  { %v470_v27 = vadd.f32 %v345_v25, %v263_v16  ;;  %v347_v28 = vpop.f32.mrb[1].mxu0 }
 0x140   :  { %v471_v29 = vadd.f32 %v347_v28, %v265_v17  ;;  %v349_v30 = vpop.f32.mrb[2].mxu0 }
 0x141   :  { %v364_v31 = vmul.f32 %v470_v27, %v362_v26  ;;  %v350_v32 = vpop.f32.mrb[3].mxu0 }
 0x142   :  { %v365_v33 = vmul.f32 %v471_v29, %v363_v23 }
 0x143   :  { %366 = vst [vmem:[%s831_s2] sm:$0xff] %v364_v31 }
 0x144   :  { %367 = vst [vmem:[%s831_s2 + $0x8] sm:$0xff] %v365_v33 }
 0x145   :  { %372 = vsyncpa [#allocation3], 1 }

</bundles_post_ra>
